<compile_context>
chip_gen: v6e
topology: v6e:2x2x1
jax: 0.10.0
libtpu: 0.0.40
codegen_flags: <defaults>
</compile_context>

<pallas_src>
import functools

import jax
import jax.numpy as jnp
from jax.experimental import pallas as pl
from jax.experimental.pallas import tpu as pltpu


def _attention_map_kernel(w_ref, b_ref, k_ref, out_ref, *, valid_hw):
    """One grid step == `bt` batch elements.

    w_ref:   (bt, nh, Cq)      folded (scaled-query x Wk) weights, k.dtype
    b_ref:   (bt, nh, 1)       folded (scaled-query x bk) bias, f32
    k_ref:   (bt, Cq, HW_pad)  channel-major image features (lane-dense in HW)
    out_ref: (bt, nh, HW_pad)  f32 joint-softmax attention map
    """
    # Single MXU contraction over the channel dim per batch element.
    logits = jnp.einsum(
        'bnc,bcs->bns', w_ref[...], k_ref[...],
        preferred_element_type=jnp.float32)
    logits = logits + b_ref[...]                       # (bt, nh, HW_pad), f32

    hw_pad = logits.shape[-1]
    if valid_hw != hw_pad:
        # Lane padding: exclude padded spatial positions from the softmax.
        col = jax.lax.broadcasted_iota(jnp.int32, logits.shape, dimension=2)
        logits = jnp.where(col < valid_hw, logits, -jnp.inf)

    # Joint softmax over (heads, HW) per batch element -- matches torch's
    # softmax(weights.flatten(2), dim=-1) for Q == 1.
    m = jnp.max(logits, axis=(1, 2), keepdims=True)    # (bt, 1, 1)
    e = jnp.exp(logits - m)
    s = jnp.sum(e, axis=(1, 2), keepdims=True)         # (bt, 1, 1)
    inv = 1.0 / s                                      # exact (tiny divide)
    out_ref[...] = (e * inv).astype(out_ref.dtype)


def _pick_batch_tile(B, per_batch_block_bytes, budget_bytes):
    """Largest divisor of B fitting a double-buffered VMEM budget while keeping
    the grid length >= 2 (so both v7x TensorCores get work)."""
    best = 1
    for bt in range(1, B + 1):
        if B % bt:
            continue
        if 2 * bt * per_batch_block_bytes > budget_bytes:
            continue
        if B >= 2 and B // bt < 2:
            continue
        best = bt
    return best


def mha_attention_map(q, k_nchw, wq, bq, wk, bk, num_heads,
                      mask=None, batch_tile=None):
    """Pallas forward of DETR's MHAttentionMap.  Returns (B, Q, nh, H, W)."""
    if mask is not None:
        # TODO(synk): wire the optional mask (masked_fill(-inf) pre-softmax).
        raise NotImplementedError("mask is not supported by this kernel")

    B, Q, Cq = q.shape
    Bk, Ck, H, W = k_nchw.shape
    assert Bk == B and Ck == Cq, "k must be (B, query_dim, H, W)"
    assert Q == 1, "torch repeat semantics only valid for Q == 1"
    hidden = wq.shape[0]
    assert wq.shape == (hidden, Cq) and wk.shape == (hidden, Cq)
    assert hidden % num_heads == 0
    head_dim = hidden // num_heads
    HW = H * W
    HW_pad = ((HW + 127) // 128) * 128
    normalize_fact = float(hidden / num_heads) ** (-0.5)

    # ---- tiny, hoisted to XLA: fold the scaled q projection into Wk / bk ----
    f32 = jnp.float32
    qp = (q[:, 0, :].astype(f32) @ wq.astype(f32).T + bq.astype(f32)) * normalize_fact
    qp = qp.reshape(B, num_heads, head_dim)                        # (B, nh, hd)
    w_eff = jnp.einsum('bnd,ndc->bnc', qp,
                       wk.astype(f32).reshape(num_heads, head_dim, Cq))
    b_eff = jnp.einsum('bnd,nd->bn', qp,
                       bk.astype(f32).reshape(num_heads, head_dim))
    b_eff = b_eff.reshape(B, num_heads, 1)

    # ---- k stays channel-major: NCHW -> (B, Cq, HW) is metadata-only ----
    k_cf = k_nchw.reshape(B, Cq, HW)              # no cast: keep bf16 if given
    if HW_pad != HW:
        k_cf = jnp.pad(k_cf, ((0, 0), (0, 0), (0, HW_pad - HW)))
    w_eff = w_eff.astype(k_cf.dtype)              # bf16 MXU path when k is bf16

    # ---- batch blocking sized against a conservative VMEM budget ----
    itemsize = k_cf.dtype.itemsize
    per_b = (Cq * HW_pad * itemsize               # k block
             + num_heads * HW_pad * 4             # out block (f32)
             + num_heads * Cq * itemsize          # w_eff block
             + num_heads * 4)                     # b_eff block
    if batch_tile is None:
        batch_tile = _pick_batch_tile(B, per_b, budget_bytes=24 * 1024 * 1024)
    assert B % batch_tile == 0
    grid = (B // batch_tile,)
    vmem_limit = min(64 * 1024 * 1024,
                     max(32 * 1024 * 1024, 4 * batch_tile * per_b))

    kernel = functools.partial(_attention_map_kernel, valid_hw=HW)

    out = pl.pallas_call(
        kernel,
        out_shape=jax.ShapeDtypeStruct((B, num_heads, HW_pad), jnp.float32),
        grid=grid,
        in_specs=[
            pl.BlockSpec((batch_tile, num_heads, Cq), lambda i: (i, 0, 0)),   # W_eff
            pl.BlockSpec((batch_tile, num_heads, 1), lambda i: (i, 0, 0)),    # b_eff
            pl.BlockSpec((batch_tile, Cq, HW_pad), lambda i: (i, 0, 0)),      # k
        ],
        out_specs=pl.BlockSpec((batch_tile, num_heads, HW_pad),
                               lambda i: (i, 0, 0)),
        compiler_params=pltpu.CompilerParams(
            dimension_semantics=("parallel",),
            vmem_limit_bytes=int(vmem_limit)),
    )(w_eff, b_eff, k_cf)

    if HW_pad != HW:
        out = out[..., :HW]                        # drop lane padding
    # Metadata-only view back to the torch 'bqnhw' output shape (Q == 1).
    return out.reshape(B, Q, num_heads, H, W)


def mha_attention_map_ref(q, k_nchw, wq, bq, wk, bk, num_heads):
    """Pure-JAX reference mirroring the torch code (Q == 1)."""
    B, Q, Cq = q.shape
    _, _, H, W = k_nchw.shape
    hidden = wq.shape[0]
    head_dim = hidden // num_heads
    norm = float(hidden / num_heads) ** (-0.5)
    qp = q @ wq.T + bq                                                # (B, Q, hidden)
    kp = jnp.einsum('bchw,dc->bdhw', k_nchw, wk) + bk[None, :, None, None]
    qh = qp.reshape(B, 1, num_heads, head_dim)
    qh = jnp.tile(qh, (1, Q, 1, 1))
    kh = kp.reshape(B, num_heads, head_dim, H, W)
    w = jnp.einsum('bqnc,bnchw->bqnhw', qh * norm, kh)
    flat = w.reshape(B, Q, -1)
    return jax.nn.softmax(flat, axis=-1).reshape(w.shape)


if __name__ == "__main__":
    B, Q = 2, 1
    query_dim, hidden_dim, num_heads = 32, 32, 4
    H, W = 16, 16

    key = jax.random.PRNGKey(0)
    k1, k2, k3, k4 = jax.random.split(key, 4)

    # __init__: xavier_uniform_ weights, zero biases (deterministic in-script)
    bound = (6.0 / (query_dim + hidden_dim)) ** 0.5
    wq = jax.random.uniform(k1, (hidden_dim, query_dim), jnp.float32, -bound, bound)
    wk = jax.random.uniform(k2, (hidden_dim, query_dim), jnp.float32, -bound, bound)
    bq = jnp.zeros((hidden_dim,), jnp.float32)
    bk = jnp.zeros((hidden_dim,), jnp.float32)

    q = jax.random.normal(k3, (B, Q, query_dim), jnp.float32)
    k_img = jax.random.normal(k4, (B, query_dim, H, W), jnp.float32)

    out = mha_attention_map(q, k_img, wq, bq, wk, bk, num_heads)
    out = jax.block_until_ready(out)

    ref = mha_attention_map_ref(q, k_img, wq, bq, wk, bk, num_heads)
    assert out.shape == (B, Q, num_heads, H, W)
    assert jnp.allclose(out, ref, atol=1e-5, rtol=1e-3), "mismatch vs reference"
    # attention map sums to ~1 over (heads, H, W) per (b, q)
    assert jnp.allclose(out.reshape(B, Q, -1).sum(-1), 1.0, atol=1e-4)

    print("KERNEL_OK")
</pallas_src>

<mosaic_0001>
module attributes {stable_mosaic.version = 11 : i64} {
  func.func @_attention_map_kernel(%arg0: i32, %arg1: memref<1x4x32xf32, #tpu.memory_space<vmem>>, %arg2: memref<1x4x1xf32, #tpu.memory_space<vmem>>, %arg3: memref<1x32x256xf32, #tpu.memory_space<vmem>>, %arg4: memref<1x4x256xf32, #tpu.memory_space<vmem>>) attributes {dimension_semantics = [#tpu.dimension_semantics<parallel>], iteration_bounds = array<i64: 2>, scalar_prefetch = 0 : i64, scratch_operands = 0 : i64, tpu.core_type = #tpu.core_type<tc>, window_params = [{transform_indices = @transform_0, window_bounds = array<i64: 1, 4, 32>}, {transform_indices = @transform_1, window_bounds = array<i64: 1, 4, 1>}, {transform_indices = @transform_2, window_bounds = array<i64: 1, 32, 256>}, {transform_indices = @transform_3, window_bounds = array<i64: 1, 4, 256>}]} {
    %c0 = arith.constant 0 : index
    %c0_0 = arith.constant 0 : index
    %c0_1 = arith.constant 0 : index
    %0 = vector.load %arg1[%c0, %c0_0, %c0_1] : memref<1x4x32xf32, #tpu.memory_space<vmem>>, vector<1x4x32xf32>
    %c0_2 = arith.constant 0 : index
    %c0_3 = arith.constant 0 : index
    %c0_4 = arith.constant 0 : index
    %1 = vector.load %arg3[%c0_2, %c0_3, %c0_4] : memref<1x32x256xf32, #tpu.memory_space<vmem>>, vector<1x32x256xf32>
    "tpu.trace_start"() <{level = 10 : i32, message = "bnc,bcs->bns"}> : () -> ()
    %cst = arith.constant dense<0.000000e+00> : vector<1x4x256xf32>
    %2 = tpu.matmul %0, %1, %cst {dimension_numbers = #tpu.dot_dimension_numbers<[2], [1], [1], [2], [0, 0, 0, 1, 1, 2], [0], [0]>} : vector<1x4x32xf32>, vector<1x32x256xf32>, vector<1x4x256xf32> -> vector<1x4x256xf32>
    "tpu.trace_stop"() : () -> ()
    %c0_5 = arith.constant 0 : index
    %c0_6 = arith.constant 0 : index
    %c0_7 = arith.constant 0 : index
    %3 = vector.load %arg2[%c0_5, %c0_6, %c0_7] : memref<1x4x1xf32, #tpu.memory_space<vmem>>, vector<1x4x1xf32>
    %4 = vector.broadcast %3 : vector<1x4x1xf32> to vector<1x4x256xf32>
    %5 = arith.addf %2, %4 : vector<1x4x256xf32>
    %cst_8 = arith.constant dense<0xFF800000> : vector<1xf32>
    %6 = vector.multi_reduction <maximumf>, %5, %cst_8 [1, 2] : vector<1x4x256xf32> to vector<1xf32>
    %7 = vector.shape_cast %6 : vector<1xf32> to vector<1x1x1xf32>
    %8 = vector.broadcast %7 : vector<1x1x1xf32> to vector<1x4x256xf32>
    %9 = arith.subf %5, %8 : vector<1x4x256xf32>
    %10 = math.exp %9 : vector<1x4x256xf32>
    %cst_9 = arith.constant dense<0.000000e+00> : vector<1xf32>
    %11 = vector.multi_reduction <add>, %10, %cst_9 [1, 2] : vector<1x4x256xf32> to vector<1xf32>
    %12 = vector.shape_cast %11 : vector<1xf32> to vector<1x1x1xf32>
    %cst_10 = arith.constant 1.000000e+00 : f32
    %13 = vector.broadcast %cst_10 : f32 to vector<1x1x1xf32>
    %14 = arith.divf %13, %12 : vector<1x1x1xf32>
    %15 = vector.broadcast %14 : vector<1x1x1xf32> to vector<1x4x256xf32>
    %16 = arith.mulf %10, %15 : vector<1x4x256xf32>
    %c0_11 = arith.constant 0 : index
    %c0_12 = arith.constant 0 : index
    %c0_13 = arith.constant 0 : index
    %17 = vector.load %arg4[%c0_11, %c0_12, %c0_13] : memref<1x4x256xf32, #tpu.memory_space<vmem>>, vector<1x4x256xf32>
    tpu.vector_store %arg4[%c0_11, %c0_12, %c0_13], %16 {strides = array<i32>} : memref<1x4x256xf32, #tpu.memory_space<vmem>>, vector<1x4x256xf32>,
    return
  }
  func.func @transform_0(%arg0: i32) -> (i32, i32, i32) {
    %c0_i32 = arith.constant 0 : i32
    %c0_i32_0 = arith.constant 0 : i32
    %c0_i32_1 = arith.constant 0 : i32
    return %arg0, %c0_i32, %c0_i32_0 : i32, i32, i32
  }
  func.func @transform_1(%arg0: i32) -> (i32, i32, i32) {
    %c0_i32 = arith.constant 0 : i32
    %c0_i32_0 = arith.constant 0 : i32
    %c0_i32_1 = arith.constant 0 : i32
    return %arg0, %c0_i32, %c0_i32_0 : i32, i32, i32
  }
  func.func @transform_2(%arg0: i32) -> (i32, i32, i32) {
    %c0_i32 = arith.constant 0 : i32
    %c0_i32_0 = arith.constant 0 : i32
    %c0_i32_1 = arith.constant 0 : i32
    return %arg0, %c0_i32, %c0_i32_0 : i32, i32, i32
  }
  func.func @transform_3(%arg0: i32) -> (i32, i32, i32) {
    %c0_i32 = arith.constant 0 : i32
    %c0_i32_0 = arith.constant 0 : i32
    %c0_i32_1 = arith.constant 0 : i32
    return %arg0, %c0_i32, %c0_i32_0 : i32, i32, i32
  }
}

</mosaic_0001>

<bundles_post_ra>
// kernel: tpu_custom_call.1
= control target key start
LH: loop header
LB: loop body
LE: loop exit
PB: predicated region body
PF: predicated region fallthrough
CT: control target
= control target key end

     0   :  { %8 = vsyncpa [#allocation3], 0  ;;  %s809_s0 = inlined_call_operand.vmem [shape: f32[2,4,32], index: 0, kind: input, shape index: {}]   ;;  %s810_s1 = inlined_call_operand.vmem [shape: f32[2,4,1], index: 1, kind: input, shape index: {}]   ;;  %s811_s2 = inlined_call_operand.hbm [shape: f32[2,32,256], index: 2, kind: input, shape index: {}]   ;;  %s812_s3 = inlined_call_operand.hbm [shape: f32[2,4,256], index: 3, kind: output, shape index: {}]  }
   0x1   :  { %10 = vsyncpa [#allocation3 + $0x1], 0 }
   0x2   :  { %11 = vsyncpa [#allocation4], 0 }
   0x3   :  { %13 = vsyncpa [#allocation4 + $0x1], 0  ;;  %s656_s12 = smov 0   ;;  %s658_s13 = smov 0  }
   0x4   :  { %s660_s14 = smov 0   ;;  %s662_s15 = smov 0  }
   0x5 LB: > { %s677_s16 = sadd.s32 4294967295, %s628_s15   ;;  %s460_s17 = sadd.s32 4294967294, %s628_s15   ;;  %s628_s15 = sphi %s662_s15, %s827_s15   ;;  %s624_s14 = sphi %s660_s14, %s826_s14   ;;  %s620_s13 = sphi %s658_s13, %s825_s13   ;;  %s616_s12 = sphi %s656_s12, %s824_s12  }
   0x6   : > { %s681_s18 = sadd.s32 1, %s628_s15   ;;  %s78_s19 = sadd.s32 1, %s624_s14 }
   0x7   : > { %s75_s20 = ssub.s32 %s628_s15, %s681_s18  ;;  %p85_p0 = scmp.ne.s32.totalorder %s624_s14, %s620_s13 }
   0x8   : > { %p76_p1 = scmp.eq.s32.totalorder %s75_s20, 0  ;;  %p86_p2 = scmp.eq.s32.totalorder %s628_s15, 0 }
   0x9   : > { %p91_p3 = scmp.ne.s32.totalorder %s620_s13, %s616_s12  ;;  %p92_p4 = scmp.eq.s32.totalorder %s677_s16, 0 }
   0xa   : > { %s693_s21 = scalar_select %p76_p1, %s624_s14, %s78_s19  }
   0xb   : > { %p695_p5 = por %p86_p2, %p85_p0  ;;  %p699_p6 = por %p92_p4, %p91_p3 }
   0xc   : > { %p115_p7 = scmp.eq.s32.totalorder %s677_s16, 1  ;;  %p121_p8 = scmp.eq.s32.totalorder %s460_s17, 1 }
   0xd   : > { %s816_s23 = scalar_select %p699_p6, 1, 0 }
   0xe   : > { %p491_p10 = scmp.lt.s32.totalorder %s628_s15, 2  ;;  %p706_p11 = por %p115_p7, %p85_p0 }
   0xf   : > { %p710_p12 = por %p121_p8, %p91_p3  ;;  %s155_s26 = sand.u32 1, %s624_s14  }
  0x10   : > { %s817_s24 = scalar_select %p706_p11, 1, 0 }
  0x11   : > { %s818_s25 = scalar_select %p710_p12, 1, 0 }
  0x12   : > { %s477_s27 = sshll.u32 %s628_s15, 10  ;;  %s463_s28 = sshll.u32 %s155_s26, 6 }
  0x13   : > { %s719_s4 = scalar_lea.hbm %s811_s2, %s477_s27  ;;  %s159_s5 = scalar_lea.vmem [#allocation2], %s463_s28 }
  0x14   : > { %s166_s6 = sshll.u32 %s159_s5, 4  ;;  %p723_p13 = pnand %p491_p10, %p695_p5  ;;  %s727_s6 = int_to_ptr.vmem [resolvable:$true] %s166_s6 }
  0x15   : > { %s729_s8 = scalar_lea.sflag [#allocation3], %s155_s26  ;;  %s536_s9 = scalar_lea.hbm %s719_s4, 1024 }
  0x16   : > { %p537_p0 = scmp.ne.s32.totalorder %s719_s4, %s536_s9  ;;  %p538_p1 = pneg %p723_p13 }
  0x17   : > { %s541_s17 = scalar_lea.hbm %s811_s2, 2048  ;;  %p542_p4 = scmp.lt.s32.totalorder %s719_s4, %s811_s2 }
  0x18   : > { %p539_p2 = pnand %p538_p1, %p537_p0  ;;  %p543_p5 = scmp.lt.s32.totalorder %s541_s17, %s536_s9 }
  0x1a   : > { %p540_p3 = pneg %p539_p2  ;;  %p544_p7 = por %p543_p5, %p542_p4 }
  0x1c   : > { %p545_p8 = pnand %p544_p7, %p540_p3 }
  0x1e   : > { %548 = shalt.err (!%p545_p8)
}
  0x1f   : > { %s549_s22 = scalar_lea.vmem %s727_s6, 1024  ;;  %s630_s26 = smov [#allocation2]  }
  0x20   : > { %p550_p10 = scmp.ne.s32.totalorder %s727_s6, %s549_s22  ;;  %s554_s27 = sshll.u32 %s630_s26, 4  ;;  %s555_s27 = int_to_ptr.vmem [resolvable:$false] %s554_s27 }
  0x21   : > { %s556_s28 = scalar_lea.vmem %s555_s27, 2048  ;;  %p557_p2 = scmp.lt.s32.totalorder %s727_s6, %s555_s27 }
  0x22   : > { %p552_p9 = pnand %p550_p10, %p538_p1  ;;  %p558_p12 = scmp.lt.s32.totalorder %s556_s28, %s549_s22 }
  0x24   : > { %p553_p0 = pneg %p552_p9  ;;  %p559_p11 = por %p558_p12, %p557_p2 }
  0x26   : > { %p560_p6 = pnand %p559_p11, %p553_p0 }
  0x28   : > { %563 = shalt.err (!%p560_p6)
}
  0x29   : > { %s631_s29 = smov 256   ;;  %s632_s30 = smov 16  }
  0x2a   : > { %486 = dma.hbm_to_vmem [thread:$0]  (!%p723_p13), %s719_s4, 1024, %s727_s6, %s729_s8, %s631_s29, %s631_s29, %s632_s30  }
  0x2b   : > { %p466_p9 = scmp.ge.s32.totalorder %s628_s15, 1  ;;  %p174_p1 = scmp.lt.s32.totalorder %s628_s15, 3 }
  0x2d   : > { %p175_p3 = pnand %p466_p9, %p174_p1 }
  0x2e   : > { %s753_s5 = sand.u32 (!%p175_p3), 1, %s620_s13   ;;  %p820_p6 = scmp.ne.s32.totalorder (!%p175_p3), %s816_s23, 0 }
  0x2f   : > { %178 = sbr.rel (%p175_p3) target bundleno = 616 (0x268), region = 32  ;;  %s467_s9 = sshll.u32 (!%p175_p3), %s753_s5, 6 }
  0x30   : > { %s181_s10 = scalar_lea.sflag (!%p175_p3), [#allocation3], %s753_s5  ;;  %s184_s11 = scalar_lea.vmem (!%p175_p3), [#allocation2], %s467_s9 }
  0x34   : > { %607 = dma.done.wait (%p820_p6), %s181_s10, 1024  }
  0x35   : > { %609 = vsyncadd (%p820_p6), %s181_s10, 4294966272  ;;  %p215_p11 = scmp.lt.s32.totalorder %s677_s16, 1  ;;  %v633_v0 = vmov 0.0   ;;  %v634_v1 = vmov 0   ;;  %v231_v2 = vld [vmem:[%s184_s11 + $0x38] sm:$0xff]  ;;  %v230_v3 = vld [vmem:[%s184_s11 + $0x30] sm:$0xff] }
  0x36   : > { %306 = vmatprep.mubr.f32.mxu0 %v633_v0  ;;  %529 = vset.pattern.permute.xlu0 %v634_v1  ;;  %v229_v4 = vld [vmem:[%s184_s11 + $0x28] sm:$0xff]  ;;  %v228_v5 = vld [vmem:[%s184_s11 + $0x20] sm:$0xff]  ;;  %v227_v6 = vld [vmem:[%s184_s11 + $0x18] sm:$0xff]  ;;  %vm238_vm0 = vcmask 261120   ;;  %vm313_vm1 = vcmask 1043456   ;;  %s468_s22 = sshll.u32 %s753_s5, 3 }
  0x37   : > { %s216_s4 = scalar_select %p215_p11, %s677_s16, 1  ;;  %266 = vmatprep.subr.mxu0 %v231_v2  ;;  %v226_v7 = vld [vmem:[%s184_s11 + $0x10] sm:$0xff]  ;;  %v225_v9 = vld [vmem:[%s184_s11 + $0x8] sm:$0xff]  ;;  %v224_v10 = vld [vmem:[%s184_s11] sm:$0xff] }
  0x38   : > { %267 = vmatpush1.msra.mxu0 %v230_v3  ;;  %s478_s26 = sshll.u32 %s677_s16, 7  ;;  %s214_s27 = scalar_lea.vmem [#allocation5], %s468_s22 }
  0x39   : > { %s469_s6 = sshll.u32 %s216_s4, 2  ;;  %268 = vmatprep.subr.mxu0 %v229_v4  ;;  %s366_s28 = sshll.u32 %s214_s27, 4  ;;  %s367_s28 = int_to_ptr.vmem [resolvable:$true] %s366_s28 }
  0x3a   : > { %s222_s17 = scalar_lea.vmem %s810_s1, %s469_s6  ;;  %s218_s20 = scalar_lea.vmem %s809_s0, %s469_s6  ;;  %269 = vmatpush1.msra.mxu0 %v228_v5 }
  0x3b   : > { %v232_v8 = vld [vmem:[%s222_s17] sm:$0xf]  ;;  %270 = vmatprep.subr.mxu0 %v227_v6  ;;  %s364_s9 = scalar_lea.hbm %s812_s3, %s478_s26  ;;  %s352_s10 = scalar_lea.sflag [#allocation4], %s753_s5 }
  0x3c   : > { %235 = vperm.xlu0 %529, %v232_v8   ;;  %271 = vmatpush1.msra.mxu0 %v226_v7  ;;  %v223_v11 = vld [vmem:[%s218_s20] sm:$0xf]  ;;  %s564_s11 = scalar_lea.vmem %s367_s28, 128  ;;  %p821_p13 = scmp.ne.s32.totalorder %s817_s24, 0 }
  0x3d   : > { %272 = vmatprep.subr.mxu0 %v225_v9  ;;  %p565_p12 = scmp.ne.s32.totalorder %s367_s28, %s564_s11  ;;  %s635_s4 = smov [#allocation5]  }
  0x3e   : > { %273 = vmatpush1.msra.mxu0 %v224_v10  ;;  %s568_s6 = sshll.u32 %s635_s4, 4  ;;  %s569_s6 = int_to_ptr.vmem [resolvable:$false] %s568_s6 }
  0x3f   : > { %471 = vmatmul.mubr.msk.f32.vlgmr.msra.gmra.mxu0 %vm238_vm0, %v223_v11  ;;  %p566_p4 = pnand %p565_p12, %p821_p13  ;;  %s570_s16 = scalar_lea.vmem %s569_s6, 256 }
  0x40   : > { %p571_p7 = scmp.lt.s32.totalorder %s367_s28, %s569_s6  ;;  %p572_p8 = scmp.lt.s32.totalorder %s570_s16, %s564_s11 }
  0x41   : > { %p567_p5 = pneg %p566_p4 }
  0x42   : > { %p573_p10 = por %p572_p8, %p571_p7 }
  0x44   : > { %p574_p0 = pnand %p573_p10, %p567_p5 }
  0xb7   : > { %v236_v12 = vpop.permute.xlu0 %235 }
  0xff   : > { %v308_v13 = vpop.f32.mrf.mxu0 }
 0x100   : > { %v309_v14 = vadd.f32 %v308_v13, %v236_v12 }
 0x101   : > { %v310_v15 = vpop.f32.mrf.mxu0 }
 0x102   : > { %v311_v16 = vadd.f32 %v310_v15, %v236_v12  ;;  %v314_v17 = vsel %vm313_vm1, %v309_v14, -inf }
 0x104   : > { %v315_v18 = vsel %vm313_vm1, %v311_v16, -inf }
 0x105   : > { %v316_v19 = vmax.f32 %v314_v17, %v315_v18 }
 0x107   : > { %317 = vmax.xlane.f32.xlu0 %v316_v19 }
 0x190   : > { %v318_v20 = vpop.xlane.xlu0 %317 }
 0x191   : > { %v319_v21 = vrot.slane %v318_v20, 4 }
 0x193   : > { %v320_v22 = vmax.f32 %v318_v20, %v319_v21 }
 0x195   : > { %v321_v23 = vrot.slane %v320_v22, 2 }
 0x197   : > { %v322_v24 = vmax.f32 %v320_v22, %v321_v23 }
 0x199   : > { %v323_v25 = vrot.slane %v322_v24, 1 }
 0x19b   : > { %v324_v26 = vmax.f32 %v322_v24, %v323_v25 }
 0x19d   : > { %v325_v27 = vsub.f32 %v309_v14, %v324_v26  ;;  %v326_v28 = vsub.f32 %v311_v16, %v324_v26 }
 0x19f   : > { %v327_v29 = vmul.f32 1.442695, %v325_v27  ;;  %v329_v30 = vmul.f32 1.442695, %v326_v28 }
 0x1a1   : > { %530 = vpow2.f32 %v327_v29 }
 0x1a2   : > { %532 = vpow2.f32 %v329_v30 }
 0x1ae   : > { %v531_v31 = vpop.eup %530 }
 0x1af   : > { %v533_v32 = vpop.eup %532  ;;  %v331_v33 = vsel %vm313_vm1, %v531_v31, 0.0 }
 0x1b0   : > { %v332_v34 = vsel %vm313_vm1, %v533_v32, 0.0 }
 0x1b1   : > { %v333_v35 = vadd.f32 %v332_v34, %v331_v33 }
 0x1b3   : > { %334 = vadd.xlane.f32.xlu1 %v333_v35 }
 0x23c   : > { %v335_v36 = vpop.xlane.xlu1 %334 }
 0x23d   : > { %v336_v37 = vrot.slane %v335_v36, 4 }
 0x23f   : > { %v337_v38 = vadd.f32 %v336_v37, %v335_v36 }
 0x241   : > { %v338_v39 = vrot.slane %v337_v38, 2 }
 0x243   : > { %v339_v40 = vadd.f32 %v338_v39, %v337_v38 }
 0x245   : > { %v340_v41 = vrot.slane %v339_v40, 1 }
 0x247   : > { %v341_v42 = vadd.f32 %v340_v41, %v339_v40 }
 0x249   : > { %534 = vrcp.f32 %v341_v42 }
 0x256   : > { %v535_v43 = vpop.eup %534 }
 0x257   : > { %v344_v44 = vmul.f32 %v535_v43, %v531_v31  ;;  %v345_v45 = vmul.f32 %v535_v43, %v533_v32 }
 0x259   : > { %v348_v46 = vcombine.low %v344_v44, %v345_v45 }
 0x25b   : > { %350 = vst [vmem:[%s214_s27] sm:$0xff] %v348_v46 }
 0x25c   : > { %577 = shalt.err (!%p574_p0)
}
 0x25d   : > { %s578_s7 = scalar_lea.hbm %s364_s9, 128  ;;  %s582_s17 = scalar_lea.hbm %s812_s3, 256 }
 0x25e   : > { %p579_p2 = scmp.ne.s32.totalorder %s364_s9, %s578_s7  ;;  %p583_p3 = scmp.lt.s32.totalorder %s364_s9, %s812_s3 }
 0x25f   : > { %p584_p6 = scmp.lt.s32.totalorder %s582_s17, %s578_s7 }
 0x260   : > { %p580_p9 = pnand %p579_p2, %p821_p13 }
 0x261   : > { %p585_p11 = por %p584_p6, %p583_p3 }
 0x262   : > { %p581_p1 = pneg %p580_p9 }
 0x264   : > { %p586_p12 = pnand %p585_p11, %p581_p1 }
 0x266   : > { %589 = shalt.err (!%p586_p12)
}
 0x267   : > { %481 = dma.vmem_to_hbm [thread:$0]  (%p821_p13), %s367_s28, 128, %s364_s9, %s352_s10  }
 0x268 PF: > { %s378_s20 = sand.u32 1, %s616_s12   ;;  %p822_p4 = scmp.ne.s32.totalorder %s818_s25, 0 }
 0x269   : > { %p823_p5 = scmp.ge.s32.totalorder %s628_s15, 2  ;;  %s379_s22 = scalar_lea.sflag [#allocation4], %s378_s20 }
 0x26b   : > { %p488_p7 = pnand %p823_p5, %p822_p4 }
 0x26d   : > { %p489_p8 = pneg %p488_p7 }
 0x26f   : > { %611 = dma.done.wait (%p489_p8), %s379_s22, 128  }
 0x270   : > { %613 = vsyncadd (%p489_p8), %s379_s22, 4294967168  ;;  %p16_p10 = scmp.ge.s32.totalorder %s681_s18, 4   ;;  %s824_s12 = smov %s620_s13 }
 0x271   : > { %s825_s13 = smov %s624_s14  ;;  %s826_s14 = smov %s693_s21 }
 0x272   : > { %s827_s15 = smov %s681_s18  ;;  %18 = sbr.rel (!%p16_p10) target bundleno = 5 (0x5), region = 83 }
 0x277   :  { %384 = vsyncpa [#allocation3], 1 }
 0x278   :  { %386 = vsyncpa [#allocation3 + $0x1], 1 }
 0x279   :  { %387 = vsyncpa [#allocation4], 1 }
 0x27a   :  { %389 = vsyncpa [#allocation4 + $0x1], 1 }

</bundles_post_ra>
